<compile_context>
chip_gen: v5e
topology: v5e:2x2
jax: 0.10.0
libtpu: 0.0.40
codegen_flags: <defaults>
</compile_context>

<pallas_src>
import functools

import jax
import jax.numpy as jnp
from jax.experimental import pallas as pl
from jax.experimental.pallas import tpu as pltpu


F_IN, H1, H2, N_ACT, H_V, N_VAL = 41, 82, 40, 8, 80, 6
LANE = 128


def _policy_kernel(x_ref, w1_ref, b1_ref, w2_ref, b2_ref,
                   wh_ref, bh_ref, wvs_ref, bvs_ref,
                   out_ref, *, softmax_in_kernel):
    x = x_ref[...]                                                   # (TB, 41)

    # fc1 + ReLU   (padded weight cols are 0, so padded lanes stay exactly 0)
    h1 = jnp.maximum(
        jnp.dot(x, w1_ref[...], preferred_element_type=jnp.float32) + b1_ref[...],
        0.0)

    # fc2 + ReLU
    h2 = jnp.maximum(
        jnp.dot(h1, w2_ref[...], preferred_element_type=jnp.float32) + b2_ref[...],
        0.0)

    # fused head (128 lanes): cols [0:8) action logits, cols [8:88) value hidden
    heads = jnp.dot(h2, wh_ref[...], preferred_element_type=jnp.float32) + bh_ref[...]

    # relu(heads) feeds the value matmul directly; wvs slab rows [0:8) are zero
    # so the relu'd logit lanes contribute nothing.
    v = jnp.maximum(heads, 0.0)
    val = jnp.dot(v, wvs_ref[...], preferred_element_type=jnp.float32) + bvs_ref[...]
    # val: cols [8:14) = real value outputs, everything else exactly 0.

    lane = jax.lax.broadcasted_iota(jnp.int32, heads.shape, 1)

    if softmax_in_kernel:
        # softmax over dim=0 (batch / sublane axis), per column -> computing it
        # full-width is exact for the logit columns; others get masked away.
        m = jnp.max(heads, axis=0, keepdims=True)
        e = jnp.exp(heads - m)
        denom = jnp.sum(e, axis=0, keepdims=True)
        probs = e / denom                       # exact reciprocal (consistency)
        out_ref[...] = jnp.where(lane < N_ACT, probs, val)
    else:
        # batch-tiled path: emit raw logits; softmax(dim=0) spans the whole
        # batch so it is applied in the wrapper after slicing off padded rows.
        out_ref[...] = jnp.where(lane < N_ACT, heads, val)


def pack_params(p):
    """Pack raw (in,out)/(1,out) params into lane-aligned zero-padded slabs.

    Call ONCE and cache the result; do not call per forward pass.
    Layout:
      w1  (41, 128) : cols [0:82)  = fc1 weight
      w2  (128,128) : rows [0:82), cols [0:40) = fc2 weight
      wh  (128,128) : rows [0:40); cols [0:8) = action head, cols [8:88) = val0
      wvs (128,128) : rows [8:88), cols [8:14) = val_sum_out
    """
    w1 = jnp.zeros((F_IN, LANE), jnp.float32).at[:, :H1].set(p["w1"])
    b1 = jnp.zeros((1, LANE), jnp.float32).at[:, :H1].set(p["b1"])

    w2 = jnp.zeros((LANE, LANE), jnp.float32).at[:H1, :H2].set(p["w2"])
    b2 = jnp.zeros((1, LANE), jnp.float32).at[:, :H2].set(p["b2"])

    wh = (jnp.zeros((LANE, LANE), jnp.float32)
          .at[:H2, :N_ACT].set(p["wa"])
          .at[:H2, N_ACT:N_ACT + H_V].set(p["wv0"]))
    bh = (jnp.zeros((1, LANE), jnp.float32)
          .at[:, :N_ACT].set(p["ba"])
          .at[:, N_ACT:N_ACT + H_V].set(p["bv0"]))

    wvs = jnp.zeros((LANE, LANE), jnp.float32).at[
        N_ACT:N_ACT + H_V, N_ACT:N_ACT + N_VAL].set(p["wvs"])
    bvs = jnp.zeros((1, LANE), jnp.float32).at[
        :, N_ACT:N_ACT + N_VAL].set(p["bvs"])
    return (w1, b1, w2, b2, wh, bh, wvs, bvs)


@functools.partial(jax.jit, static_argnames=("tb",))
def policy_forward(x, packed, *, tb=2048):
    """x: (B, 41) float32, packed = pack_params(params).

    Returns (act_prob (B, 8), val_sum (B, 6)).
    """
    B = x.shape[0]

    if B <= tb:
        # Single un-tiled call: whole batch resident, softmax(dim=0) in-kernel.
        vmem = pl.BlockSpec(memory_space=pltpu.MemorySpace.VMEM)
        out = pl.pallas_call(
            functools.partial(_policy_kernel, softmax_in_kernel=True),
            out_shape=jax.ShapeDtypeStruct((B, LANE), jnp.float32),
            in_specs=[vmem] * 9,
            out_specs=vmem,
        )(x, *packed)
        return out[:, :N_ACT], out[:, N_ACT:N_ACT + N_VAL]

    # ---- Batch-tiled path for large B (pipelined, parallel over tiles). ----
    # B > tb guarantees nb >= 2, so both v7x TensorCores get work.
    nb = pl.cdiv(B, tb)
    bp = nb * tb
    x_in = x if bp == B else jnp.zeros((bp, F_IN), jnp.float32).at[:B].set(x)

    def resident(shape):
        # weights/biases: same block every grid step -> stay resident in VMEM
        return pl.BlockSpec(shape, lambda i: (0, 0))

    in_specs = [
        pl.BlockSpec((tb, F_IN), lambda i: (i, 0)),       # x tile, 41 lanes
        resident((F_IN, LANE)), resident((1, LANE)),      # w1, b1
        resident((LANE, LANE)), resident((1, LANE)),      # w2, b2
        resident((LANE, LANE)), resident((1, LANE)),      # fused head wh, bh
        resident((LANE, LANE)), resident((1, LANE)),      # wvs, bvs
    ]
    out_spec = pl.BlockSpec((tb, LANE), lambda i: (i, 0))

    # Right-sized scoped VMEM: double-buffered x/out tiles + weight slabs +
    # generous allowance for in-kernel activation temporaries, capped at 32 MiB.
    weight_bytes = (F_IN * LANE + 3 * LANE * LANE + 4 * LANE) * 4
    vmem_limit = int(2 * tb * (F_IN + LANE) * 4      # pipelined x + out buffers
                     + 2 * weight_bytes              # resident weight slabs
                     + 10 * tb * LANE * 4            # activation temporaries
                     + (4 << 20))                    # margin
    vmem_limit = min(vmem_limit, 32 << 20)

    out = pl.pallas_call(
        functools.partial(_policy_kernel, softmax_in_kernel=False),
        out_shape=jax.ShapeDtypeStruct((bp, LANE), jnp.float32),
        grid=(nb,),
        in_specs=in_specs,
        out_specs=out_spec,
        compiler_params=pltpu.CompilerParams(
            dimension_semantics=("parallel",),
            vmem_limit_bytes=vmem_limit),
    )(x_in, *packed)

    # softmax over dim=0 must span the WHOLE (unpadded) batch -> done once here.
    act = jax.nn.softmax(out[:B, :N_ACT], axis=0)
    return act, out[:B, N_ACT:N_ACT + N_VAL]


def init_params(key):
    """Deterministic init mimicking nn.Linear's uniform(-1/sqrt(fan_in), +)."""
    dims = {"1": (F_IN, H1), "2": (H1, H2), "a": (H2, N_ACT),
            "v0": (H2, H_V), "vs": (H_V, N_VAL)}
    params = {}
    for name, (fin, fout) in dims.items():
        key, kw, kb = jax.random.split(key, 3)
        bound = 1.0 / jnp.sqrt(fin)
        params[f"w{name}"] = jax.random.uniform(kw, (fin, fout), jnp.float32,
                                                -bound, bound)
        params[f"b{name}"] = jax.random.uniform(kb, (1, fout), jnp.float32,
                                                -bound, bound)
    return params


def reference_forward(x, p):
    h1 = jnp.maximum(x @ p["w1"] + p["b1"], 0.0)
    h2 = jnp.maximum(h1 @ p["w2"] + p["b2"], 0.0)
    logits = h2 @ p["wa"] + p["ba"]
    act = jax.nn.softmax(logits, axis=0)
    v = jnp.maximum(h2 @ p["wv0"] + p["bv0"], 0.0)
    val = v @ p["wvs"] + p["bvs"]
    return act, val


if __name__ == "__main__":
    key = jax.random.PRNGKey(0)
    key, kx = jax.random.split(key)
    params = init_params(key)
    packed = pack_params(params)          # packed ONCE, reused by every call

    # --- small batch: single-call path with exact in-kernel softmax ---
    B = 8
    x = jax.random.normal(kx, (B, F_IN), dtype=jnp.float32)
    act, val = policy_forward(x, packed)
    act = jax.block_until_ready(act)
    val = jax.block_until_ready(val)
    act_r, val_r = reference_forward(x, params)
    assert act.shape == (B, N_ACT) and val.shape == (B, N_VAL)
    assert jnp.allclose(act, act_r, atol=1e-4, rtol=1e-4)
    assert jnp.allclose(val, val_r, atol=1e-4, rtol=1e-4)

    # --- larger batch: batch-tiled grid path (small tile to exercise the grid
    #     + tail padding at test scale; production default tb=2048) ---
    B2 = 777
    key, kx2 = jax.random.split(key)
    x2 = jax.random.normal(kx2, (B2, F_IN), dtype=jnp.float32)
    act2, val2 = policy_forward(x2, packed, tb=256)
    act2 = jax.block_until_ready(act2)
    val2 = jax.block_until_ready(val2)
    act2_r, val2_r = reference_forward(x2, params)
    assert act2.shape == (B2, N_ACT) and val2.shape == (B2, N_VAL)
    assert jnp.allclose(act2, act2_r, atol=1e-4, rtol=1e-4)
    assert jnp.allclose(val2, val2_r, atol=1e-4, rtol=1e-4)

    print("KERNEL_OK")
</pallas_src>

<mosaic_0001>
module attributes {stable_mosaic.version = 11 : i64} {
  func.func @_policy_kernel(%arg0: memref<8x41xf32, #tpu.memory_space<vmem>>, %arg1: memref<41x128xf32, #tpu.memory_space<vmem>>, %arg2: memref<1x128xf32, #tpu.memory_space<vmem>>, %arg3: memref<128x128xf32, #tpu.memory_space<vmem>>, %arg4: memref<1x128xf32, #tpu.memory_space<vmem>>, %arg5: memref<128x128xf32, #tpu.memory_space<vmem>>, %arg6: memref<1x128xf32, #tpu.memory_space<vmem>>, %arg7: memref<128x128xf32, #tpu.memory_space<vmem>>, %arg8: memref<1x128xf32, #tpu.memory_space<vmem>>, %arg9: memref<8x128xf32, #tpu.memory_space<vmem>>) attributes {dimension_semantics = [], scalar_prefetch = 0 : i64, scratch_operands = 0 : i64, tpu.core_type = #tpu.core_type<tc>} {
    %c0 = arith.constant 0 : index
    %c0_0 = arith.constant 0 : index
    %0 = vector.load %arg0[%c0, %c0_0] : memref<8x41xf32, #tpu.memory_space<vmem>>, vector<8x41xf32>
    %c0_1 = arith.constant 0 : index
    %c0_2 = arith.constant 0 : index
    %1 = vector.load %arg1[%c0_1, %c0_2] : memref<41x128xf32, #tpu.memory_space<vmem>>, vector<41x128xf32>
    %cst = arith.constant dense<0.000000e+00> : vector<8x128xf32>
    %2 = tpu.matmul %0, %1, %cst {dimension_numbers = #tpu.dot_dimension_numbers<[1], [0], [0], [1], [0, 0, 1, 1], [], []>} : vector<8x41xf32>, vector<41x128xf32>, vector<8x128xf32> -> vector<8x128xf32>
    %c0_3 = arith.constant 0 : index
    %c0_4 = arith.constant 0 : index
    %3 = vector.load %arg2[%c0_3, %c0_4] : memref<1x128xf32, #tpu.memory_space<vmem>>, vector<1x128xf32>
    %4 = vector.broadcast %3 : vector<1x128xf32> to vector<8x128xf32>
    %5 = arith.addf %2, %4 : vector<8x128xf32>
    %cst_5 = arith.constant 0.000000e+00 : f32
    %6 = vector.broadcast %cst_5 : f32 to vector<8x128xf32>
    %7 = arith.maximumf %5, %6 : vector<8x128xf32>
    %c0_6 = arith.constant 0 : index
    %c0_7 = arith.constant 0 : index
    %8 = vector.load %arg3[%c0_6, %c0_7] : memref<128x128xf32, #tpu.memory_space<vmem>>, vector<128x128xf32>
    %cst_8 = arith.constant dense<0.000000e+00> : vector<8x128xf32>
    %9 = tpu.matmul %7, %8, %cst_8 {dimension_numbers = #tpu.dot_dimension_numbers<[1], [0], [0], [1], [0, 0, 1, 1], [], []>} : vector<8x128xf32>, vector<128x128xf32>, vector<8x128xf32> -> vector<8x128xf32>
    %c0_9 = arith.constant 0 : index
    %c0_10 = arith.constant 0 : index
    %10 = vector.load %arg4[%c0_9, %c0_10] : memref<1x128xf32, #tpu.memory_space<vmem>>, vector<1x128xf32>
    %11 = vector.broadcast %10 : vector<1x128xf32> to vector<8x128xf32>
    %12 = arith.addf %9, %11 : vector<8x128xf32>
    %cst_11 = arith.constant 0.000000e+00 : f32
    %13 = vector.broadcast %cst_11 : f32 to vector<8x128xf32>
    %14 = arith.maximumf %12, %13 : vector<8x128xf32>
    %c0_12 = arith.constant 0 : index
    %c0_13 = arith.constant 0 : index
    %15 = vector.load %arg5[%c0_12, %c0_13] : memref<128x128xf32, #tpu.memory_space<vmem>>, vector<128x128xf32>
    %cst_14 = arith.constant dense<0.000000e+00> : vector<8x128xf32>
    %16 = tpu.matmul %14, %15, %cst_14 {dimension_numbers = #tpu.dot_dimension_numbers<[1], [0], [0], [1], [0, 0, 1, 1], [], []>} : vector<8x128xf32>, vector<128x128xf32>, vector<8x128xf32> -> vector<8x128xf32>
    %c0_15 = arith.constant 0 : index
    %c0_16 = arith.constant 0 : index
    %17 = vector.load %arg6[%c0_15, %c0_16] : memref<1x128xf32, #tpu.memory_space<vmem>>, vector<1x128xf32>
    %18 = vector.broadcast %17 : vector<1x128xf32> to vector<8x128xf32>
    %19 = arith.addf %16, %18 : vector<8x128xf32>
    %cst_17 = arith.constant 0.000000e+00 : f32
    %20 = vector.broadcast %cst_17 : f32 to vector<8x128xf32>
    %21 = arith.maximumf %19, %20 : vector<8x128xf32>
    %c0_18 = arith.constant 0 : index
    %c0_19 = arith.constant 0 : index
    %22 = vector.load %arg7[%c0_18, %c0_19] : memref<128x128xf32, #tpu.memory_space<vmem>>, vector<128x128xf32>
    %cst_20 = arith.constant dense<0.000000e+00> : vector<8x128xf32>
    %23 = tpu.matmul %21, %22, %cst_20 {dimension_numbers = #tpu.dot_dimension_numbers<[1], [0], [0], [1], [0, 0, 1, 1], [], []>} : vector<8x128xf32>, vector<128x128xf32>, vector<8x128xf32> -> vector<8x128xf32>
    %c0_21 = arith.constant 0 : index
    %c0_22 = arith.constant 0 : index
    %24 = vector.load %arg8[%c0_21, %c0_22] : memref<1x128xf32, #tpu.memory_space<vmem>>, vector<1x128xf32>
    %25 = vector.broadcast %24 : vector<1x128xf32> to vector<8x128xf32>
    %26 = arith.addf %23, %25 : vector<8x128xf32>
    %27 = tpu.iota {dimensions = array<i32: 1>} : vector<8x128xi32>
    %cst_23 = arith.constant dense<0xFF800000> : vector<128xf32>
    %28 = vector.multi_reduction <maximumf>, %19, %cst_23 [0] : vector<8x128xf32> to vector<128xf32>
    %29 = vector.shape_cast %28 : vector<128xf32> to vector<1x128xf32>
    %30 = vector.broadcast %29 : vector<1x128xf32> to vector<8x128xf32>
    %31 = arith.subf %19, %30 : vector<8x128xf32>
    %32 = math.exp %31 : vector<8x128xf32>
    %cst_24 = arith.constant dense<0.000000e+00> : vector<128xf32>
    %33 = vector.multi_reduction <add>, %32, %cst_24 [0] : vector<8x128xf32> to vector<128xf32>
    %34 = vector.shape_cast %33 : vector<128xf32> to vector<1x128xf32>
    %35 = vector.broadcast %34 : vector<1x128xf32> to vector<8x128xf32>
    %36 = arith.divf %32, %35 : vector<8x128xf32>
    %c8_i32 = arith.constant 8 : i32
    %37 = vector.broadcast %c8_i32 : i32 to vector<8x128xi32>
    %38 = arith.cmpi slt, %27, %37 : vector<8x128xi32>
    %39 = arith.select %38, %36, %26 : vector<8x128xi1>, vector<8x128xf32>
    %c0_25 = arith.constant 0 : index
    %c0_26 = arith.constant 0 : index
    %40 = vector.load %arg9[%c0_25, %c0_26] : memref<8x128xf32, #tpu.memory_space<vmem>>, vector<8x128xf32>
    tpu.vector_store %arg9[%c0_25, %c0_26], %39 {strides = array<i32>} : memref<8x128xf32, #tpu.memory_space<vmem>>, vector<8x128xf32>,
    return
  }
}

</mosaic_0001>

<bundles_post_ra>
// kernel: policy_forward.1
= control target key start
LH: loop header
LB: loop body
LE: loop exit
PB: predicated region body
PF: predicated region fallthrough
CT: control target
= control target key end

     0   :  { %14 = vsyncpa [#allocation3], 0  ;;  %s542_s0 = inlined_call_operand.hbm [shape: f32[8,41], index: 0, kind: input, shape index: {}]   ;;  %s543_s1 = inlined_call_operand.hbm [shape: f32[41,128], index: 1, kind: input, shape index: {}]   ;;  %s544_s2 = inlined_call_operand.vmem [shape: f32[1,128], index: 2, kind: input, shape index: {}]   ;;  %s545_s3 = inlined_call_operand.hbm [shape: f32[128,128], index: 3, kind: input, shape index: {}]   ;;  %s546_s4 = inlined_call_operand.vmem [shape: f32[1,128], index: 4, kind: input, shape index: {}]   ;;  %s547_s5 = inlined_call_operand.hbm [shape: f32[128,128], index: 5, kind: input, shape index: {}]   ;;  %s548_s6 = inlined_call_operand.vmem [shape: f32[1,128], index: 6, kind: input, shape index: {}]   ;;  %s549_s7 = inlined_call_operand.hbm [shape: f32[128,128], index: 7, kind: input, shape index: {}]   ;;  %s550_s8 = inlined_call_operand.vmem [shape: f32[1,128], index: 8, kind: input, shape index: {}]   ;;  %s551_s9 = inlined_call_operand.vmem [shape: f32[8,128], index: 9, kind: output, shape index: {}]  }
   0x1   :  { %15 = vsyncpa [#allocation5], 0  ;;  %s32_s11 = sshll.u32 %s543_s1, 4  ;;  %s33_s11 = int_to_ptr.hbm [resolvable:$true] %s32_s11 }
   0x2   :  { %16 = vsyncpa [#allocation8], 0  ;;  %s455_s12 = smov [#allocation4]   ;;  %s62_s16 = sshll.u32 %s547_s5, 4  ;;  %s63_s16 = int_to_ptr.hbm [resolvable:$true] %s62_s16 }
   0x3   :  { %s34_s13 = sshll.u32 %s455_s12, 4  ;;  %s456_s17 = smov 128   ;;  %s35_s13 = int_to_ptr.vmem [resolvable:$true] %s34_s13 }
   0x4   :  { %s457_s18 = smov 8   ;;  %s458_s19 = smov [#allocation7]  }
   0x5   :  { %40 = dma.hbm_to_vmem [thread:$0]  %s33_s11, 768, %s35_s13, [#allocation5], %s456_s17, %s456_s17, %s457_s18  }
   0x6   :  { %s64_s20 = sshll.u32 %s458_s19, 4  ;;  %s22_s23 = sshll.u32 %s542_s0, 4  ;;  %s65_s20 = int_to_ptr.vmem [resolvable:$true] %s64_s20  ;;  %s23_s23 = int_to_ptr.hbm [resolvable:$true] %s22_s23 }
   0x7   :  { %70 = dma.hbm_to_vmem [thread:$0]  %s63_s16, 2048, %s65_s20, [#allocation8], %s456_s17, %s456_s17, %s457_s18  }
   0x8   :  { %s47_s25 = sshll.u32 %s545_s3, 4  ;;  %s459_s26 = smov [#allocation2]   ;;  %s48_s25 = int_to_ptr.hbm [resolvable:$true] %s47_s25 }
   0x9   :  { %s24_s27 = sshll.u32 %s459_s26, 4  ;;  %s460_s5 = smov [#allocation6]   ;;  %s25_s27 = int_to_ptr.vmem [resolvable:$true] %s24_s27 }
   0xa   :  { %27 = dma.hbm_to_vmem [thread:$0]  %s23_s23, 128, %s25_s27, [#allocation3]  }
   0xb   :  { %s49_s28 = sshll.u32 %s460_s5, 4  ;;  %s77_s10 = sshll.u32 %s549_s7, 4  ;;  %s50_s28 = int_to_ptr.vmem [resolvable:$true] %s49_s28  ;;  %s78_s10 = int_to_ptr.hbm [resolvable:$true] %s77_s10 }
   0xc   :  { %55 = dma.hbm_to_vmem [thread:$0]  %s48_s25, 2048, %s50_s28, [#allocation5], %s456_s17, %s456_s17, %s457_s18  }
   0xd   :  { %s461_s0 = smov [#allocation9]  }
   0xe   :  { %s79_s11 = sshll.u32 %s461_s0, 4  ;;  %s80_s11 = int_to_ptr.vmem [resolvable:$true] %s79_s11 }
   0xf   :  { %85 = dma.hbm_to_vmem [thread:$0]  %s78_s10, 2048, %s80_s11, [#allocation8], %s456_s17, %s456_s17, %s457_s18  }
  0x10   :  { %449 = dma.done.wait [#allocation3], 128  }
  0x11   :  { %450 = vsyncadd [#allocation3], 4294967168 }
  0x12   :  { %451 = dma.done.wait [#allocation5], 2816  }
  0x13   :  { %452 = vsyncadd [#allocation5], 4294964480 }
  0x14   :  { %453 = dma.done.wait [#allocation8], 4096  }
  0x15   :  { %454 = vsyncadd [#allocation8], 4294963200  ;;  %vm123_vm0 = vcmask 1040384   ;;  %v114_v0 = vld [vmem:[#allocation4 + $0x28] sm:$0x1]  ;;  %v113_v1 = vld [vmem:[#allocation4 + $0x20] sm:$0xff] }
  0x16   :  { %312 = vmatpush.msk.msra.mxu0 %vm123_vm0, %v114_v0  ;;  %v112_v2 = vld [vmem:[#allocation4 + $0x18] sm:$0xff]  ;;  %v163_v3 = vld [vmem:[#allocation6 + $0x78] sm:$0xff]  ;;  %v162_v4 = vld [vmem:[#allocation6 + $0x70] sm:$0xff]  ;;  %vm119_vm1 = vcmask 334848  }
  0x17   :  { %168 = vmatpush.msra.mxu1 %v163_v3  ;;  %v111_v5 = vld [vmem:[#allocation4 + $0x10] sm:$0xff]  ;;  %v161_v6 = vld [vmem:[#allocation6 + $0x68] sm:$0xff]  ;;  %v110_v7 = vld [vmem:[#allocation4 + $0x8] sm:$0xff] }
  0x18   :  { %138 = vmatpush.msra.mxu0 %v113_v1  ;;  %v160_v8 = vld [vmem:[#allocation6 + $0x60] sm:$0xff]  ;;  %v109_v9 = vld [vmem:[#allocation4] sm:$0xff]  ;;  %v159_v10 = vld [vmem:[#allocation6 + $0x58] sm:$0xff] }
  0x19   :  { %169 = vmatpush.msra.mxu1 %v162_v4  ;;  %v108_v11 = vld [vmem:[#allocation2] sm:$0xff]  ;;  %v158_v12 = vld [vmem:[#allocation6 + $0x50] sm:$0xff]  ;;  %v156_v14 = vld [vmem:[#allocation6 + $0x40] sm:$0xff] }
  0x1a   :  { %139 = vmatpush.msra.mxu0 %v112_v2  ;;  %v157_v13 = vld [vmem:[#allocation6 + $0x48] sm:$0xff]  ;;  %v155_v15 = vld [vmem:[#allocation6 + $0x38] sm:$0xff]  ;;  %v154_v16 = vld [vmem:[#allocation6 + $0x30] sm:$0xff] }
  0x1b   :  { %170 = vmatpush.msra.mxu1 %v161_v6  ;;  %v153_v17 = vld [vmem:[#allocation6 + $0x28] sm:$0xff]  ;;  %v152_v18 = vld [vmem:[#allocation6 + $0x20] sm:$0xff]  ;;  %v151_v19 = vld [vmem:[#allocation6 + $0x18] sm:$0xff] }
  0x1c   :  { %140 = vmatpush.msra.mxu0 %v111_v5  ;;  %v150_v20 = vld [vmem:[#allocation6 + $0x10] sm:$0xff]  ;;  %v149_v21 = vld [vmem:[#allocation6 + $0x8] sm:$0xff]  ;;  %v148_v22 = vld [vmem:[#allocation6] sm:$0xff] }
  0x1d   :  { %171 = vmatpush.msra.mxu1 %v160_v8  ;;  %v204_v23 = vld [vmem:[#allocation7 + $0x78] sm:$0xff]  ;;  %v203_v24 = vld [vmem:[#allocation7 + $0x70] sm:$0xff]  ;;  %v202_v25 = vld [vmem:[#allocation7 + $0x68] sm:$0xff] }
  0x1e   :  { %141 = vmatpush.msra.mxu0 %v110_v7  ;;  %209 = vmatpush.msra.mxu2 %v204_v23  ;;  %v201_v26 = vld [vmem:[#allocation7 + $0x60] sm:$0xff]  ;;  %v200_v27 = vld [vmem:[#allocation7 + $0x58] sm:$0xff]  ;;  %v199_v28 = vld [vmem:[#allocation7 + $0x50] sm:$0xff]  ;;  %v270_v23 = vlaneseq }
  0x1f   :  { %172 = vmatpush.msra.mxu1 %v159_v10  ;;  %v198_v29 = vld [vmem:[#allocation7 + $0x48] sm:$0xff]  ;;  %v197_v30 = vld [vmem:[#allocation7 + $0x40] sm:$0xff]  ;;  %v196_v31 = vld [vmem:[#allocation7 + $0x38] sm:$0xff] }
  0x20   :  { %142 = vmatpush.msra.mxu0 %v109_v9  ;;  %210 = vmatpush.msra.mxu2 %v203_v24  ;;  %v195_v32 = vld [vmem:[#allocation7 + $0x30] sm:$0xff]  ;;  %v194_v33 = vld [vmem:[#allocation7 + $0x28] sm:$0xff]  ;;  %v193_v34 = vld [vmem:[#allocation7 + $0x20] sm:$0xff] }
  0x21   :  { %313 = vmatmul.msk.f32.vlgmr.msra.gmra.mxu0 %vm119_vm1, %v108_v11  ;;  %173 = vmatpush.msra.mxu1 %v158_v12  ;;  %v192_v35 = vld [vmem:[#allocation7 + $0x18] sm:$0xff]  ;;  %v321_v36 = vld [vmem:[%s544_s2] ss:$0 sm:$0xff]  ;;  %v191_v40 = vld [vmem:[#allocation7 + $0x10] sm:$0xff] }
  0x22   :  { %211 = vmatpush.msra.mxu2 %v202_v25  ;;  %v190_v41 = vld [vmem:[#allocation7 + $0x8] sm:$0xff]  ;;  %v189_v42 = vld [vmem:[#allocation7] sm:$0xff]  ;;  %v245_v43 = vld [vmem:[#allocation9 + $0x78] sm:$0xff] }
  0x23   :  { %174 = vmatpush.msra.mxu1 %v157_v13  ;;  %v244_v44 = vld [vmem:[#allocation9 + $0x70] sm:$0xff]  ;;  %250 = vmatpush.msra.mxu3 %v245_v43  ;;  %v243_v45 = vld [vmem:[#allocation9 + $0x68] sm:$0xff]  ;;  %v242_v46 = vld [vmem:[#allocation9 + $0x60] sm:$0xff] }
  0x24   :  { %212 = vmatpush.msra.mxu2 %v201_v26  ;;  %v241_v47 = vld [vmem:[#allocation9 + $0x58] sm:$0xff]  ;;  %v240_v48 = vld [vmem:[#allocation9 + $0x50] sm:$0xff]  ;;  %v239_v49 = vld [vmem:[#allocation9 + $0x48] sm:$0xff] }
  0x25   :  { %175 = vmatpush.msra.mxu1 %v156_v14  ;;  %251 = vmatpush.msra.mxu3 %v244_v44  ;;  %v238_v50 = vld [vmem:[#allocation9 + $0x40] sm:$0xff]  ;;  %v237_v51 = vld [vmem:[#allocation9 + $0x38] sm:$0xff]  ;;  %v236_v52 = vld [vmem:[#allocation9 + $0x30] sm:$0xff] }
  0x26   :  { %213 = vmatpush.msra.mxu2 %v200_v27  ;;  %v235_v53 = vld [vmem:[#allocation9 + $0x28] sm:$0xff]  ;;  %v234_v54 = vld [vmem:[#allocation9 + $0x20] sm:$0xff]  ;;  %v233_v55 = vld [vmem:[#allocation9 + $0x18] sm:$0xff]  ;;  %v271_v27 = vand.u32 127, %v270_v23 }
  0x27   :  { %176 = vmatpush.msra.mxu1 %v155_v15  ;;  %252 = vmatpush.msra.mxu3 %v243_v45  ;;  %v322_v56 = vld [vmem:[%s546_s4] ss:$0 sm:$0xff]  ;;  %v232_v60 = vld [vmem:[#allocation9 + $0x10] sm:$0xff]  ;;  %v230_v62 = vld [vmem:[#allocation9] sm:$0xff] }
  0x28   :  { %214 = vmatpush.msra.mxu2 %v199_v28  ;;  %v231_v61 = vld [vmem:[#allocation9 + $0x8] sm:$0xff]  ;;  %vm302_vm6 = vcmp.lt.s32.totalorder %v271_v27, 8 }
  0x29   :  { %177 = vmatpush.msra.mxu1 %v154_v16  ;;  %253 = vmatpush.msra.mxu3 %v242_v46  ;;  %v323_v63 = vld [vmem:[%s548_s6] ss:$0 sm:$0xff] }
  0x2a   :  { %215 = vmatpush.msra.mxu2 %v198_v29  ;;  %v324_v29 = vld [vmem:[%s550_s8] ss:$0 sm:$0xff] }
  0x2b   :  { %178 = vmatpush.msra.mxu1 %v153_v17  ;;  %254 = vmatpush.msra.mxu3 %v241_v47 }
  0x2c   :  { %216 = vmatpush.msra.mxu2 %v197_v30 }
  0x2d   :  { %179 = vmatpush.msra.mxu1 %v152_v18  ;;  %255 = vmatpush.msra.mxu3 %v240_v48 }
  0x2e   :  { %217 = vmatpush.msra.mxu2 %v196_v31 }
  0x2f   :  { %180 = vmatpush.msra.mxu1 %v151_v19  ;;  %256 = vmatpush.msra.mxu3 %v239_v49 }
  0x30   :  { %218 = vmatpush.msra.mxu2 %v195_v32 }
  0x31   :  { %181 = vmatpush.msra.mxu1 %v150_v20  ;;  %257 = vmatpush.msra.mxu3 %v238_v50 }
  0x32   :  { %219 = vmatpush.msra.mxu2 %v194_v33 }
  0x33   :  { %182 = vmatpush.msra.mxu1 %v149_v21  ;;  %258 = vmatpush.msra.mxu3 %v237_v51 }
  0x34   :  { %220 = vmatpush.msra.mxu2 %v193_v34 }
  0x35   :  { %183 = vmatpush.msra.mxu1 %v148_v22  ;;  %259 = vmatpush.msra.mxu3 %v236_v52 }
  0x36   :  { %221 = vmatpush.msra.mxu2 %v192_v35 }
  0x37   :  { %260 = vmatpush.msra.mxu3 %v235_v53 }
  0x38   :  { %222 = vmatpush.msra.mxu2 %v191_v40 }
  0x39   :  { %261 = vmatpush.msra.mxu3 %v234_v54 }
  0x3a   :  { %223 = vmatpush.msra.mxu2 %v190_v41 }
  0x3b   :  { %262 = vmatpush.msra.mxu3 %v233_v55 }
  0x3c   :  { %224 = vmatpush.msra.mxu2 %v189_v42 }
  0x3d   :  { %263 = vmatpush.msra.mxu3 %v232_v60 }
  0x3f   :  { %264 = vmatpush.msra.mxu3 %v231_v61 }
  0x41   :  { %265 = vmatpush.msra.mxu3 %v230_v62 }
  0x9e   :  { %v144_v37 = vpop.f32.mrf.mxu0 }
  0x9f   :  { %v145_v38 = vadd.f32 %v321_v36, %v144_v37 }
  0xa1   :  { %v147_v39 = vmax.f32 %v145_v38, 0.0 }
  0xa3   :  { %184 = vmatmul.f32.vlgmr.msra.gmra.mxu1 %v147_v39 }
 0x120   :  { %v185_v57 = vpop.f32.mrf.mxu1 }
 0x121   :  { %v186_v58 = vadd.f32 %v322_v56, %v185_v57 }
 0x123   :  { %v188_v59 = vmax.f32 %v186_v58, 0.0 }
 0x125   :  { %225 = vmatmul.f32.vlgmr.msra.gmra.mxu2 %v188_v59 }
 0x1a8   :  { %v226_v0 = vpop.f32.mrf.mxu2 }
 0x1a9   :  { %v227_v1 = vadd.f32 %v323_v63, %v226_v0 }
 0x1ab   :  { %v229_v2 = vmax.f32 %v227_v1, 0.0  ;;  %v272_v3 = vrot.slane %v227_v1, 4 }
 0x1ad   :  { %266 = vmatmul.f32.vlgmr.msra.gmra.mxu3 %v229_v2  ;;  %v273_v4 = vmax.f32 %v227_v1, %v272_v3 }
 0x1af   :  { %v274_v5 = vrot.slane %v273_v4, 2 }
 0x1b1   :  { %v275_v6 = vmax.f32 %v273_v4, %v274_v5 }
 0x1b3   :  { %v276_v7 = vrot.slane %v275_v6, 1 }
 0x1b5   :  { %v277_v8 = vmax.f32 %v275_v6, %v276_v7 }
 0x1b7   :  { %v278_v9 = vsub.f32 %v227_v1, %v277_v8 }
 0x1b9   :  { %v279_v10 = vmul.f32 1.442695, %v278_v9 }
 0x1bb   :  { %325 = vpow2.f32 %v279_v10 }
 0x1c1   :  { %v326_v11 = vpop.eup %325 }
 0x1c2   :  { %v281_v12 = vrot.slane %v326_v11, 4 }
 0x1c4   :  { %v282_v13 = vadd.f32 %v326_v11, %v281_v12 }
 0x1c6   :  { %v283_v14 = vrot.slane %v282_v13, 2 }
 0x1c8   :  { %v284_v15 = vadd.f32 %v283_v14, %v282_v13 }
 0x1ca   :  { %v285_v16 = vrot.slane %v284_v15, 1 }
 0x1cc   :  { %v286_v17 = vadd.f32 %v285_v16, %v284_v15 }
 0x1ce   :  { %327 = vrcp.f32 %v286_v17  ;;  %v298_v24 = vand.u32 2147483648, %v286_v17  ;;  %vm292_vm3 = vweird.f32 %v286_v17  ;;  %v296_v25 = vand.u32 2147483647, %v286_v17 }
 0x1d0   :  { %v299_v28 = vor.u32 1.1754944e-38, %v298_v24  ;;  %vm297_vm5 = vcmp.eq.f32.partialorder %v296_v25, 8.507059e+37 }
 0x1d4   :  { %v328_v18 = vpop.eup %327 }
 0x1d5   :  { %v288_v19 = vmul.f32 %v328_v18, %v286_v17  ;;  %vm293_vm2 = vweird.f32 %v328_v18 }
 0x1d6   :  { %vm294_vm4 = vmor %vm292_vm3, %vm293_vm2 }
 0x1d7   :  { %v289_v20 = vsub.f32 1.0, %v288_v19 }
 0x1d9   :  { %v290_v21 = vmul.f32 %v328_v18, %v289_v20 }
 0x1db   :  { %v291_v22 = vadd.f32 %v328_v18, %v290_v21 }
 0x1dd   :  { %v295_v26 = vsel %vm294_vm4, %v328_v18, %v291_v22 }
 0x1de   :  { %v300_v30 = vsel %vm297_vm5, %v299_v28, %v295_v26 }
 0x1df   :  { %v301_v33 = vmul.f32 %v326_v11, %v300_v30 }
 0x230   :  { %v267_v31 = vpop.f32.mrf.mxu3 }
 0x231   :  { %v268_v32 = vadd.f32 %v324_v29, %v267_v31 }
 0x233   :  { %v303_v34 = vsel %vm302_vm6, %v301_v33, %v268_v32 }
 0x234   :  { %304 = vst [vmem:[%s551_s9] sm:$0xff] %v303_v34 }
 0x235   :  { %309 = vsyncpa [#allocation3], 1 }
 0x236   :  { %310 = vsyncpa [#allocation5], 1 }
 0x237   :  { %311 = vsyncpa [#allocation8], 1 }

</bundles_post_ra>
